<compile_context>
chip_gen: v7x
topology: tpu7x:2x2x1
jax: 0.10.0
libtpu: 0.0.40
codegen_flags: <defaults>
</compile_context>

<pallas_src>
import functools

import jax
import jax.numpy as jnp
from jax.experimental import pallas as pl
from jax.experimental.pallas import tpu as pltpu


# --------------------------------------------------------------------------- #
# Kernel
# --------------------------------------------------------------------------- #
def class_layer_kernel(x_ref, gamma_ref, beta_ref, w_ref, b_ref, out_ref,
                       acc_ref, *, inv_s, eps):
    s = pl.program_id(1)

    # Zero the running sum on the first sequence step of each batch tile.
    @pl.when(s == 0)
    def _():
        acc_ref[...] = jnp.zeros_like(acc_ref)

    # Streaming partial sum over this sequence tile (f32 accumulation; input may
    # be bf16 -- cast on load, hidden under the DMA of the next tile).
    acc_ref[...] += jnp.sum(x_ref[...].astype(jnp.float32), axis=1)      # (TB, E)

    # LayerNorm + Linear only once, on the last sequence step.
    @pl.when(s == pl.num_programs(1) - 1)
    def _():
        mean_x = acc_ref[...] * inv_s                                    # (TB, E)
        mu = jnp.mean(mean_x, axis=-1, keepdims=True)                    # (TB, 1)
        xc = mean_x - mu
        var = jnp.mean(xc * xc, axis=-1, keepdims=True)                  # biased
        normed = xc * jax.lax.rsqrt(var + eps)                           # EUP rsqrt
        normed = normed * gamma_ref[...] + beta_ref[...]                 # (1,E) bcast
        y = jnp.dot(normed, w_ref[...].astype(jnp.float32),
                    preferred_element_type=jnp.float32)                  # (TB, Cp)
        out_ref[...] = (y + b_ref[...]).astype(out_ref.dtype)


# --------------------------------------------------------------------------- #
# Tile / VMEM selection helpers
# --------------------------------------------------------------------------- #
def _sublane_align(dtype):
    # vreg sublane packing: f32 -> 8 rows, bf16 -> 16, int8/fp8 -> 32.
    return {4: 8, 2: 16, 1: 32}.get(jnp.dtype(dtype).itemsize, 8)


def _vmem_capacity_bytes():
    try:
        return int(pltpu.get_tpu_info().vmem_capacity_bytes)
    except Exception:
        return 64 * 1024 * 1024  # conservative: v7x per-TensorCore VMEM


def _pick_tb(B, target=256):
    """Batch tile: largest divisor of B, multiple of 8, <= target, and <= B/2
    when B >= 16 so the parallel grid axis has >= 2 steps (v7x megacore)."""
    cap = min(B, target)
    if B >= 16:
        cap = min(cap, B // 2)
    for t in range(cap, 0, -1):
        if B % t == 0 and t % 8 == 0:
            return t
    return B  # no legal sub-tile; take the whole batch (correctness first)


def _solve_ts(S, align, fits):
    """Largest divisor of S that is tiling-legal (multiple of 8 or == S),
    prefers dtype-packing alignment, and fits the VMEM budget."""
    divisors = [t for t in range(S, 0, -1) if S % t == 0]
    legal = [t for t in divisors if t % 8 == 0 or t == S]
    preferred = [t for t in legal if t % align == 0 or t == S]
    for t in preferred:
        if fits(t):
            return t
    for t in legal:
        if fits(t):
            return t
    return legal[-1]


# --------------------------------------------------------------------------- #
# Wrapper
# --------------------------------------------------------------------------- #
def prepare_class_layer_params(gamma, beta, w, b):
    """One-time preprocessing (hoisted out of the hot path): reshape LN params to
    lane-major slabs and zero-pad the class dim of the Linear to a multiple of
    128 so the kernel output is lane-dense."""
    E, C = w.shape
    C_pad = ((C + 127) // 128) * 128
    gamma2 = gamma.reshape(1, E).astype(jnp.float32)
    beta2 = beta.reshape(1, E).astype(jnp.float32)
    w_pad = jnp.zeros((E, C_pad), dtype=w.dtype).at[:, :C].set(w)
    b_pad = jnp.zeros((1, C_pad), dtype=jnp.float32).at[0, :C].set(
        b.astype(jnp.float32))
    return {"gamma": gamma2, "beta": beta2, "w": w_pad, "b": b_pad,
            "n_classes": C}


def class_layer_apply(x, params, *, eps=1e-5, tb_target=256):
    """x: (B, S, E) f32/bf16; params from prepare_class_layer_params.
    Returns (B, n_classes) f32."""
    B, S, E = x.shape
    gamma2, beta2 = params["gamma"], params["beta"]
    w_pad, b_pad = params["w"], params["b"]
    C = params["n_classes"]
    C_pad = w_pad.shape[1]
    assert w_pad.shape[0] == E and gamma2.shape == (1, E)

    x_item = jnp.dtype(x.dtype).itemsize
    w_item = jnp.dtype(w_pad.dtype).itemsize

    # Hardware-derived VMEM budget (leave ~22% for the compiler / fragmentation).
    usable_vmem = max(int(_vmem_capacity_bytes() * 0.78), 16 * 1024 * 1024)

    TB = _pick_tb(B, tb_target)
    param_bytes = E * C_pad * w_item + 2 * E * 4 + C_pad * 4

    last_err = None
    # Attempt 1: single-buffer the constant params (frees VMEM for a bigger TS).
    # Attempt 2: plain default buffering (known-good configuration).
    for single_buffer_params in (True, False):
        pbufs = 1 if single_buffer_params else 2

        def est_bytes(ts, _pbufs=pbufs):
            return (2 * TB * ts * E * x_item        # streamed x (double-buffered)
                    + 2 * TB * C_pad * 4            # output (double-buffered)
                    + _pbufs * param_bytes          # resident LN / Linear params
                    + TB * E * 4)                   # f32 accumulator scratch

        def fits(ts, _est=est_bytes):
            return int(_est(ts) * 1.15) + (2 << 20) <= usable_vmem

        TS = _solve_ts(S, _sublane_align(x.dtype), fits)
        grid = (B // TB, S // TS)
        vmem_limit = min(usable_vmem,
                         max(int(est_bytes(TS) * 1.15) + (2 << 20), 16 << 20))

        if single_buffer_params:
            def const_spec(shape):
                return pl.BlockSpec(shape, lambda i, s: (0, 0),
                                    pipeline_mode=pl.Buffered(1))
        else:
            def const_spec(shape):
                return pl.BlockSpec(shape, lambda i, s: (0, 0))

        try:
            call = pl.pallas_call(
                functools.partial(class_layer_kernel, inv_s=1.0 / S, eps=eps),
                out_shape=jax.ShapeDtypeStruct((B, C_pad), jnp.float32),
                grid_spec=pltpu.PrefetchScalarGridSpec(
                    num_scalar_prefetch=0,
                    grid=grid,
                    in_specs=[
                        pl.BlockSpec((TB, TS, E), lambda i, s: (i, s, 0)),  # x
                        const_spec((1, E)),                                 # gamma
                        const_spec((1, E)),                                 # beta
                        const_spec((E, C_pad)),                             # w
                        const_spec((1, C_pad)),                             # b
                    ],
                    out_specs=pl.BlockSpec((TB, C_pad), lambda i, s: (i, 0)),
                    scratch_shapes=[pltpu.VMEM((TB, E), jnp.float32)],
                ),
                compiler_params=pltpu.CompilerParams(
                    dimension_semantics=("parallel", "arbitrary"),
                    vmem_limit_bytes=int(vmem_limit),
                ),
            )
            out = call(x, gamma2, beta2, w_pad, b_pad)
            return out[:, :C]
        except Exception as e:  # fall back to the known-good buffering config
            last_err = e
            if not single_buffer_params:
                raise
    raise last_err  # unreachable


def class_layer(x, gamma, beta, w, b, *, eps=1e-5, tb_target=256):
    """Convenience one-shot wrapper (pads params inline)."""
    return class_layer_apply(x, prepare_class_layer_params(gamma, beta, w, b),
                             eps=eps, tb_target=tb_target)


# --------------------------------------------------------------------------- #
# Reference + self-test
# --------------------------------------------------------------------------- #
def reference(x, gamma, beta, w, b, eps=1e-5):
    mean_x = jnp.mean(x.astype(jnp.float32), axis=1)
    mu = jnp.mean(mean_x, axis=-1, keepdims=True)
    var = jnp.mean((mean_x - mu) ** 2, axis=-1, keepdims=True)
    normed = (mean_x - mu) / jnp.sqrt(var + eps) * gamma + beta
    return normed @ w.astype(jnp.float32) + b.astype(jnp.float32)


if __name__ == "__main__":
    # Small shapes consistent with the module: batch=2, seq=8, emb=32, classes=100.
    B, S, E, C = 2, 8, 32, 100
    key = jax.random.PRNGKey(0)
    kx, kw, kb = jax.random.split(key, 3)

    x = jax.random.normal(kx, (B, S, E), dtype=jnp.float32)

    # Deterministic parameter init (nn.LayerNorm default: gamma=1, beta=0;
    # nn.Linear: uniform(-1/sqrt(E), 1/sqrt(E))).
    gamma = jnp.ones((E,), dtype=jnp.float32)
    beta = jnp.zeros((E,), dtype=jnp.float32)
    bound = 1.0 / (E ** 0.5)
    w = jax.random.uniform(kw, (E, C), minval=-bound, maxval=bound, dtype=jnp.float32)
    b = jax.random.uniform(kb, (C,), minval=-bound, maxval=bound, dtype=jnp.float32)

    # Pad/reshape params once (hoisted preprocessing), reuse for both dtypes.
    params = prepare_class_layer_params(gamma, beta, w, b)

    # f32 path.
    out = jax.block_until_ready(class_layer_apply(x, params))
    ref = reference(x, gamma, beta, w, b)
    assert out.shape == (B, C), out.shape
    assert jnp.allclose(out, ref, atol=1e-4, rtol=1e-4), float(jnp.abs(out - ref).max())

    # bf16 streaming path (halves HBM traffic for x; f32 accumulation in-kernel).
    x_bf16 = x.astype(jnp.bfloat16)
    out_bf = jax.block_until_ready(class_layer_apply(x_bf16, params))
    ref_bf = reference(x_bf16.astype(jnp.float32), gamma, beta, w, b)
    assert jnp.allclose(out_bf, ref_bf, atol=1e-3, rtol=1e-3), \
        float(jnp.abs(out_bf - ref_bf).max())

    print("KERNEL_OK")
</pallas_src>

<mosaic_0001>
module attributes {stable_mosaic.version = 11 : i64} {
  func.func @class_layer_kernel(%arg0: i32, %arg1: i32, %arg2: memref<2x8x32xf32, #tpu.memory_space<vmem>>, %arg3: memref<1x32xf32, #tpu.memory_space<vmem>>, %arg4: memref<1x32xf32, #tpu.memory_space<vmem>>, %arg5: memref<32x128xf32, #tpu.memory_space<vmem>>, %arg6: memref<1x128xf32, #tpu.memory_space<vmem>>, %arg7: memref<2x128xf32, #tpu.memory_space<vmem>>, %arg8: memref<2x32xf32, #tpu.memory_space<vmem>>) attributes {dimension_semantics = [#tpu.dimension_semantics<parallel>, #tpu.dimension_semantics<arbitrary>], iteration_bounds = array<i64: 1, 1>, scalar_prefetch = 0 : i64, scratch_operands = 1 : i64, tpu.core_type = #tpu.core_type<tc>, window_params = [{transform_indices = @transform_0, window_bounds = array<i64: 2, 8, 32>}, {pipeline_mode = #tpu.pipeline_mode<synchronous>, transform_indices = @transform_1, window_bounds = array<i64: 1, 32>}, {pipeline_mode = #tpu.pipeline_mode<synchronous>, transform_indices = @transform_2, window_bounds = array<i64: 1, 32>}, {pipeline_mode = #tpu.pipeline_mode<synchronous>, transform_indices = @transform_3, window_bounds = array<i64: 32, 128>}, {pipeline_mode = #tpu.pipeline_mode<synchronous>, transform_indices = @transform_4, window_bounds = array<i64: 1, 128>}, {transform_indices = @transform_5, window_bounds = array<i64: 2, 128>}]} {
    %c0_i32 = arith.constant 0 : i32
    %0 = arith.cmpi eq, %arg1, %c0_i32 : i32
    %1 = arith.extui %0 : i1 to i32
    %c0_i32_0 = arith.constant 0 : i32
    %2 = arith.cmpi ne, %1, %c0_i32_0 : i32
    scf.if %2 {
      %cst_9 = arith.constant 0.000000e+00 : f32
      %11 = vector.broadcast %cst_9 : f32 to vector<2x32xf32>
      %c0_10 = arith.constant 0 : index
      %c0_11 = arith.constant 0 : index
      %12 = vector.load %arg8[%c0_10, %c0_11] : memref<2x32xf32, #tpu.memory_space<vmem>>, vector<2x32xf32>
      tpu.vector_store %arg8[%c0_10, %c0_11], %11 {strides = array<i32>} : memref<2x32xf32, #tpu.memory_space<vmem>>, vector<2x32xf32>,
    } else {
    }
    %c0 = arith.constant 0 : index
    %c0_1 = arith.constant 0 : index
    %3 = vector.load %arg8[%c0, %c0_1] : memref<2x32xf32, #tpu.memory_space<vmem>>, vector<2x32xf32>
    %c0_2 = arith.constant 0 : index
    %c0_3 = arith.constant 0 : index
    %c0_4 = arith.constant 0 : index
    %4 = vector.load %arg2[%c0_2, %c0_3, %c0_4] : memref<2x8x32xf32, #tpu.memory_space<vmem>>, vector<2x8x32xf32>
    %cst = arith.constant dense<0.000000e+00> : vector<2x32xf32>
    %5 = vector.multi_reduction <add>, %4, %cst [1] : vector<2x8x32xf32> to vector<2x32xf32>
    %6 = arith.addf %3, %5 : vector<2x32xf32>
    %c0_5 = arith.constant 0 : index
    %c0_6 = arith.constant 0 : index
    %7 = vector.load %arg8[%c0_5, %c0_6] : memref<2x32xf32, #tpu.memory_space<vmem>>, vector<2x32xf32>
    tpu.vector_store %arg8[%c0_5, %c0_6], %6 {strides = array<i32>} : memref<2x32xf32, #tpu.memory_space<vmem>>, vector<2x32xf32>,
    %c0_i32_7 = arith.constant 0 : i32
    %8 = arith.cmpi eq, %arg1, %c0_i32_7 : i32
    %9 = arith.extui %8 : i1 to i32
    %c0_i32_8 = arith.constant 0 : i32
    %10 = arith.cmpi ne, %9, %c0_i32_8 : i32
    scf.if %10 {
      %c0_9 = arith.constant 0 : index
      %c0_10 = arith.constant 0 : index
      %11 = vector.load %arg8[%c0_9, %c0_10] : memref<2x32xf32, #tpu.memory_space<vmem>>, vector<2x32xf32>
      %cst_11 = arith.constant 1.250000e-01 : f32
      %12 = vector.broadcast %cst_11 : f32 to vector<2x32xf32>
      %13 = arith.mulf %11, %12 : vector<2x32xf32>
      %cst_12 = arith.constant dense<0.000000e+00> : vector<2xf32>
      %14 = vector.multi_reduction <add>, %13, %cst_12 [1] : vector<2x32xf32> to vector<2xf32>
      %15 = vector.shape_cast %14 : vector<2xf32> to vector<2x1xf32>
      %cst_13 = arith.constant 3.200000e+01 : f32
      %16 = vector.broadcast %cst_13 : f32 to vector<2x1xf32>
      %17 = arith.divf %15, %16 : vector<2x1xf32>
      %18 = vector.broadcast %17 : vector<2x1xf32> to vector<2x32xf32>
      %19 = arith.subf %13, %18 : vector<2x32xf32>
      %20 = arith.mulf %19, %19 : vector<2x32xf32>
      %cst_14 = arith.constant dense<0.000000e+00> : vector<2xf32>
      %21 = vector.multi_reduction <add>, %20, %cst_14 [1] : vector<2x32xf32> to vector<2xf32>
      %22 = vector.shape_cast %21 : vector<2xf32> to vector<2x1xf32>
      %cst_15 = arith.constant 3.200000e+01 : f32
      %23 = vector.broadcast %cst_15 : f32 to vector<2x1xf32>
      %24 = arith.divf %22, %23 : vector<2x1xf32>
      %cst_16 = arith.constant 9.99999974E-6 : f32
      %25 = vector.broadcast %cst_16 : f32 to vector<2x1xf32>
      %26 = arith.addf %24, %25 : vector<2x1xf32>
      %27 = math.rsqrt %26 : vector<2x1xf32>
      %28 = vector.broadcast %27 : vector<2x1xf32> to vector<2x32xf32>
      %29 = arith.mulf %19, %28 : vector<2x32xf32>
      %c0_17 = arith.constant 0 : index
      %c0_18 = arith.constant 0 : index
      %30 = vector.load %arg3[%c0_17, %c0_18] : memref<1x32xf32, #tpu.memory_space<vmem>>, vector<1x32xf32>
      %31 = vector.broadcast %30 : vector<1x32xf32> to vector<2x32xf32>
      %32 = arith.mulf %29, %31 : vector<2x32xf32>
      %c0_19 = arith.constant 0 : index
      %c0_20 = arith.constant 0 : index
      %33 = vector.load %arg4[%c0_19, %c0_20] : memref<1x32xf32, #tpu.memory_space<vmem>>, vector<1x32xf32>
      %34 = vector.broadcast %33 : vector<1x32xf32> to vector<2x32xf32>
      %35 = arith.addf %32, %34 : vector<2x32xf32>
      %c0_21 = arith.constant 0 : index
      %c0_22 = arith.constant 0 : index
      %36 = vector.load %arg5[%c0_21, %c0_22] : memref<32x128xf32, #tpu.memory_space<vmem>>, vector<32x128xf32>
      %cst_23 = arith.constant dense<0.000000e+00> : vector<2x128xf32>
      %37 = tpu.matmul %35, %36, %cst_23 {dimension_numbers = #tpu.dot_dimension_numbers<[1], [0], [0], [1], [0, 0, 1, 1], [], []>} : vector<2x32xf32>, vector<32x128xf32>, vector<2x128xf32> -> vector<2x128xf32>
      %c0_24 = arith.constant 0 : index
      %c0_25 = arith.constant 0 : index
      %38 = vector.load %arg6[%c0_24, %c0_25] : memref<1x128xf32, #tpu.memory_space<vmem>>, vector<1x128xf32>
      %39 = vector.broadcast %38 : vector<1x128xf32> to vector<2x128xf32>
      %40 = arith.addf %37, %39 : vector<2x128xf32>
      %c0_26 = arith.constant 0 : index
      %c0_27 = arith.constant 0 : index
      %41 = vector.load %arg7[%c0_26, %c0_27] : memref<2x128xf32, #tpu.memory_space<vmem>>, vector<2x128xf32>
      tpu.vector_store %arg7[%c0_26, %c0_27], %40 {strides = array<i32>} : memref<2x128xf32, #tpu.memory_space<vmem>>, vector<2x128xf32>,
    } else {
    }
    return
  }
  func.func @transform_0(%arg0: i32, %arg1: i32) -> (i32, i32, i32) {
    %c0_i32 = arith.constant 0 : i32
    %c0_i32_0 = arith.constant 0 : i32
    return %arg0, %arg1, %c0_i32 : i32, i32, i32
  }
  func.func @transform_1(%arg0: i32, %arg1: i32) -> (i32, i32) {
    %c0_i32 = arith.constant 0 : i32
    %c0_i32_0 = arith.constant 0 : i32
    %c0_i32_1 = arith.constant 0 : i32
    return %c0_i32, %c0_i32_0 : i32, i32
  }
  func.func @transform_2(%arg0: i32, %arg1: i32) -> (i32, i32) {
    %c0_i32 = arith.constant 0 : i32
    %c0_i32_0 = arith.constant 0 : i32
    %c0_i32_1 = arith.constant 0 : i32
    return %c0_i32, %c0_i32_0 : i32, i32
  }
  func.func @transform_3(%arg0: i32, %arg1: i32) -> (i32, i32) {
    %c0_i32 = arith.constant 0 : i32
    %c0_i32_0 = arith.constant 0 : i32
    %c0_i32_1 = arith.constant 0 : i32
    return %c0_i32, %c0_i32_0 : i32, i32
  }
  func.func @transform_4(%arg0: i32, %arg1: i32) -> (i32, i32) {
    %c0_i32 = arith.constant 0 : i32
    %c0_i32_0 = arith.constant 0 : i32
    %c0_i32_1 = arith.constant 0 : i32
    return %c0_i32, %c0_i32_0 : i32, i32
  }
  func.func @transform_5(%arg0: i32, %arg1: i32) -> (i32, i32) {
    %c0_i32 = arith.constant 0 : i32
    %c0_i32_0 = arith.constant 0 : i32
    return %arg0, %c0_i32 : i32, i32
  }
}

module attributes {stable_mosaic.version = 11 : i64} {
  func.func @class_layer_kernel(%arg0: i32, %arg1: i32, %arg2: memref<2x8x32xf32, #tpu.memory_space<vmem>>, %arg3: memref<1x32xf32, #tpu.memory_space<vmem>>, %arg4: memref<1x32xf32, #tpu.memory_space<vmem>>, %arg5: memref<32x128xf32, #tpu.memory_space<vmem>>, %arg6: memref<1x128xf32, #tpu.memory_space<vmem>>, %arg7: memref<2x128xf32, #tpu.memory_space<vmem>>, %arg8: memref<2x32xf32, #tpu.memory_space<vmem>>) attributes {dimension_semantics = [#tpu.dimension_semantics<parallel>, #tpu.dimension_semantics<arbitrary>], iteration_bounds = array<i64: 1, 1>, scalar_prefetch = 0 : i64, scratch_operands = 1 : i64, tpu.core_type = #tpu.core_type<tc>, window_params = [{transform_indices = @transform_0, window_bounds = array<i64: 2, 8, 32>}, {pipeline_mode = #tpu.pipeline_mode<synchronous>, transform_indices = @transform_1, window_bounds = array<i64: 1, 32>}, {pipeline_mode = #tpu.pipeline_mode<synchronous>, transform_indices = @transform_2, window_bounds = array<i64: 1, 32>}, {pipeline_mode = #tpu.pipeline_mode<synchronous>, transform_indices = @transform_3, window_bounds = array<i64: 32, 128>}, {pipeline_mode = #tpu.pipeline_mode<synchronous>, transform_indices = @transform_4, window_bounds = array<i64: 1, 128>}, {transform_indices = @transform_5, window_bounds = array<i64: 2, 128>}]} {
    %c0_i32 = arith.constant 0 : i32
    %0 = arith.cmpi eq, %arg1, %c0_i32 : i32
    %1 = arith.extui %0 : i1 to i32
    %c0_i32_0 = arith.constant 0 : i32
    %2 = arith.cmpi ne, %1, %c0_i32_0 : i32
    scf.if %2 {
      %cst_9 = arith.constant 0.000000e+00 : f32
      %11 = vector.broadcast %cst_9 : f32 to vector<2x32xf32>
      %c0_10 = arith.constant 0 : index
      %c0_11 = arith.constant 0 : index
      %12 = vector.load %arg8[%c0_10, %c0_11] : memref<2x32xf32, #tpu.memory_space<vmem>>, vector<2x32xf32>
      tpu.vector_store %arg8[%c0_10, %c0_11], %11 {strides = array<i32>} : memref<2x32xf32, #tpu.memory_space<vmem>>, vector<2x32xf32>,
    } else {
    }
    %c0 = arith.constant 0 : index
    %c0_1 = arith.constant 0 : index
    %3 = vector.load %arg8[%c0, %c0_1] : memref<2x32xf32, #tpu.memory_space<vmem>>, vector<2x32xf32>
    %c0_2 = arith.constant 0 : index
    %c0_3 = arith.constant 0 : index
    %c0_4 = arith.constant 0 : index
    %4 = vector.load %arg2[%c0_2, %c0_3, %c0_4] : memref<2x8x32xf32, #tpu.memory_space<vmem>>, vector<2x8x32xf32>
    %cst = arith.constant dense<0.000000e+00> : vector<2x32xf32>
    %5 = vector.multi_reduction <add>, %4, %cst [1] : vector<2x8x32xf32> to vector<2x32xf32>
    %6 = arith.addf %3, %5 : vector<2x32xf32>
    %c0_5 = arith.constant 0 : index
    %c0_6 = arith.constant 0 : index
    %7 = vector.load %arg8[%c0_5, %c0_6] : memref<2x32xf32, #tpu.memory_space<vmem>>, vector<2x32xf32>
    tpu.vector_store %arg8[%c0_5, %c0_6], %6 {strides = array<i32>} : memref<2x32xf32, #tpu.memory_space<vmem>>, vector<2x32xf32>,
    %c0_i32_7 = arith.constant 0 : i32
    %8 = arith.cmpi eq, %arg1, %c0_i32_7 : i32
    %9 = arith.extui %8 : i1 to i32
    %c0_i32_8 = arith.constant 0 : i32
    %10 = arith.cmpi ne, %9, %c0_i32_8 : i32
    scf.if %10 {
      %c0_9 = arith.constant 0 : index
      %c0_10 = arith.constant 0 : index
      %11 = vector.load %arg8[%c0_9, %c0_10] : memref<2x32xf32, #tpu.memory_space<vmem>>, vector<2x32xf32>
      %cst_11 = arith.constant 1.250000e-01 : f32
      %12 = vector.broadcast %cst_11 : f32 to vector<2x32xf32>
      %13 = arith.mulf %11, %12 : vector<2x32xf32>
      %cst_12 = arith.constant dense<0.000000e+00> : vector<2xf32>
      %14 = vector.multi_reduction <add>, %13, %cst_12 [1] : vector<2x32xf32> to vector<2xf32>
      %15 = vector.shape_cast %14 : vector<2xf32> to vector<2x1xf32>
      %cst_13 = arith.constant 3.200000e+01 : f32
      %16 = vector.broadcast %cst_13 : f32 to vector<2x1xf32>
      %17 = arith.divf %15, %16 : vector<2x1xf32>
      %18 = vector.broadcast %17 : vector<2x1xf32> to vector<2x32xf32>
      %19 = arith.subf %13, %18 : vector<2x32xf32>
      %20 = arith.mulf %19, %19 : vector<2x32xf32>
      %cst_14 = arith.constant dense<0.000000e+00> : vector<2xf32>
      %21 = vector.multi_reduction <add>, %20, %cst_14 [1] : vector<2x32xf32> to vector<2xf32>
      %22 = vector.shape_cast %21 : vector<2xf32> to vector<2x1xf32>
      %cst_15 = arith.constant 3.200000e+01 : f32
      %23 = vector.broadcast %cst_15 : f32 to vector<2x1xf32>
      %24 = arith.divf %22, %23 : vector<2x1xf32>
      %cst_16 = arith.constant 9.99999974E-6 : f32
      %25 = vector.broadcast %cst_16 : f32 to vector<2x1xf32>
      %26 = arith.addf %24, %25 : vector<2x1xf32>
      %27 = math.rsqrt %26 : vector<2x1xf32>
      %28 = vector.broadcast %27 : vector<2x1xf32> to vector<2x32xf32>
      %29 = arith.mulf %19, %28 : vector<2x32xf32>
      %c0_17 = arith.constant 0 : index
      %c0_18 = arith.constant 0 : index
      %30 = vector.load %arg3[%c0_17, %c0_18] : memref<1x32xf32, #tpu.memory_space<vmem>>, vector<1x32xf32>
      %31 = vector.broadcast %30 : vector<1x32xf32> to vector<2x32xf32>
      %32 = arith.mulf %29, %31 : vector<2x32xf32>
      %c0_19 = arith.constant 0 : index
      %c0_20 = arith.constant 0 : index
      %33 = vector.load %arg4[%c0_19, %c0_20] : memref<1x32xf32, #tpu.memory_space<vmem>>, vector<1x32xf32>
      %34 = vector.broadcast %33 : vector<1x32xf32> to vector<2x32xf32>
      %35 = arith.addf %32, %34 : vector<2x32xf32>
      %c0_21 = arith.constant 0 : index
      %c0_22 = arith.constant 0 : index
      %36 = vector.load %arg5[%c0_21, %c0_22] : memref<32x128xf32, #tpu.memory_space<vmem>>, vector<32x128xf32>
      %cst_23 = arith.constant dense<0.000000e+00> : vector<2x128xf32>
      %37 = tpu.matmul %35, %36, %cst_23 {dimension_numbers = #tpu.dot_dimension_numbers<[1], [0], [0], [1], [0, 0, 1, 1], [], []>} : vector<2x32xf32>, vector<32x128xf32>, vector<2x128xf32> -> vector<2x128xf32>
      %c0_24 = arith.constant 0 : index
      %c0_25 = arith.constant 0 : index
      %38 = vector.load %arg6[%c0_24, %c0_25] : memref<1x128xf32, #tpu.memory_space<vmem>>, vector<1x128xf32>
      %39 = vector.broadcast %38 : vector<1x128xf32> to vector<2x128xf32>
      %40 = arith.addf %37, %39 : vector<2x128xf32>
      %c0_26 = arith.constant 0 : index
      %c0_27 = arith.constant 0 : index
      %41 = vector.load %arg7[%c0_26, %c0_27] : memref<2x128xf32, #tpu.memory_space<vmem>>, vector<2x128xf32>
      tpu.vector_store %arg7[%c0_26, %c0_27], %40 {strides = array<i32>} : memref<2x128xf32, #tpu.memory_space<vmem>>, vector<2x128xf32>,
    } else {
    }
    return
  }
  func.func @transform_0(%arg0: i32, %arg1: i32) -> (i32, i32, i32) {
    %c0_i32 = arith.constant 0 : i32
    %c0_i32_0 = arith.constant 0 : i32
    return %arg0, %arg1, %c0_i32 : i32, i32, i32
  }
  func.func @transform_1(%arg0: i32, %arg1: i32) -> (i32, i32) {
    %c0_i32 = arith.constant 0 : i32
    %c0_i32_0 = arith.constant 0 : i32
    %c0_i32_1 = arith.constant 0 : i32
    return %c0_i32, %c0_i32_0 : i32, i32
  }
  func.func @transform_2(%arg0: i32, %arg1: i32) -> (i32, i32) {
    %c0_i32 = arith.constant 0 : i32
    %c0_i32_0 = arith.constant 0 : i32
    %c0_i32_1 = arith.constant 0 : i32
    return %c0_i32, %c0_i32_0 : i32, i32
  }
  func.func @transform_3(%arg0: i32, %arg1: i32) -> (i32, i32) {
    %c0_i32 = arith.constant 0 : i32
    %c0_i32_0 = arith.constant 0 : i32
    %c0_i32_1 = arith.constant 0 : i32
    return %c0_i32, %c0_i32_0 : i32, i32
  }
  func.func @transform_4(%arg0: i32, %arg1: i32) -> (i32, i32) {
    %c0_i32 = arith.constant 0 : i32
    %c0_i32_0 = arith.constant 0 : i32
    %c0_i32_1 = arith.constant 0 : i32
    return %c0_i32, %c0_i32_0 : i32, i32
  }
  func.func @transform_5(%arg0: i32, %arg1: i32) -> (i32, i32) {
    %c0_i32 = arith.constant 0 : i32
    %c0_i32_0 = arith.constant 0 : i32
    return %arg0, %c0_i32 : i32, i32
  }
}

</mosaic_0001>

<bundles_post_ra>
// kernel: tpu_custom_call.1
= control target key start
LH: loop header
LB: loop body
LE: loop exit
PB: predicated region body
PF: predicated region fallthrough
CT: control target
= control target key end

     0   :  { %10 = vsyncpa [#allocation4], 0  ;;  %s415_s0 = inlined_call_operand.hbm [shape: f32[2,8,32], index: 0, kind: input, shape index: {}]   ;;  %s416_s1 = inlined_call_operand.vmem [shape: f32[1,32], index: 1, kind: input, shape index: {}]   ;;  %s417_s2 = inlined_call_operand.vmem [shape: f32[1,32], index: 2, kind: input, shape index: {}]   ;;  %s418_s3 = inlined_call_operand.hbm [shape: f32[32,128], index: 3, kind: input, shape index: {}]   ;;  %s419_s4 = inlined_call_operand.vmem [shape: f32[1,128], index: 4, kind: input, shape index: {}]   ;;  %s420_s5 = inlined_call_operand.hbm [shape: f32[2,128], index: 5, kind: output, shape index: {}]  }
   0x1   :  { %11 = vsyncpa [#allocation7], 0 }
   0x2   :  { %12 = vsyncpa [#allocation5], 0  ;;  %s325_s18 = smov [#allocation3]   ;;  %s253_s22 = scalar_lea.hbm %s415_s0, 256 }
   0x3   :  { %s18_s19 = sshll.u32 %s325_s18, 4  ;;  %p254_p0 = scmp.ne.s32.totalorder %s415_s0, %s253_s22  ;;  %s19_s19 = int_to_ptr.vmem [resolvable:$true] %s18_s19 }
   0x4   :  { %p257_p1 = scmp.lt.u32.totalorder %s253_s22, %s415_s0 }
   0x6   :  { %p259_p2 = pnand %p257_p1, %p254_p0 }
   0x8   :  { %262 = shalt.err (!%p259_p2)
}
   0x9   :  { %s263_s27 = scalar_lea.vmem %s19_s19, 256  ;;  %p268_p4 = scmp.lt.s32.totalorder %s19_s19, %s19_s19 }
   0xa   :  { %p264_p3 = scmp.ne.s32.totalorder %s19_s19, %s263_s27  ;;  %p269_p5 = scmp.lt.s32.totalorder %s263_s27, %s263_s27 }
   0xc   :  { %p270_p6 = por %p269_p5, %p268_p4 }
   0xe   :  { %p271_p7 = pnand %p270_p6, %p264_p3 }
  0x10   :  { %274 = shalt.err (!%p271_p7)
}
  0x11   :  { %s326_s28 = smov 128   ;;  %s327_s29 = smov 8  }
  0x12   :  { %24 = dma.hbm_to_vmem [thread:$0]  %s415_s0, 256, %s19_s19, [#allocation4], %s326_s28, %s326_s28, %s327_s29  }
  0x13   :  { %s328_s7 = smov [#allocation6]   ;;  %s275_s11 = scalar_lea.hbm %s418_s3, 512 }
  0x14   :  { %s34_s8 = sshll.u32 %s328_s7, 4  ;;  %p276_p8 = scmp.ne.s32.totalorder %s418_s3, %s275_s11  ;;  %s35_s8 = int_to_ptr.vmem [resolvable:$true] %s34_s8 }
  0x15   :  { %p279_p9 = scmp.lt.u32.totalorder %s275_s11, %s418_s3 }
  0x17   :  { %p281_p10 = pnand %p279_p9, %p276_p8 }
  0x19   :  { %284 = shalt.err (!%p281_p10)
}
  0x1a   :  { %s285_s16 = scalar_lea.vmem %s35_s8, 512  ;;  %p290_p12 = scmp.lt.s32.totalorder %s35_s8, %s35_s8 }
  0x1b   :  { %p286_p11 = scmp.ne.s32.totalorder %s35_s8, %s285_s16  ;;  %p291_p13 = scmp.lt.s32.totalorder %s285_s16, %s285_s16 }
  0x1d   :  { %p292_p0 = por %p291_p13, %p290_p12 }
  0x1f   :  { %p293_p1 = pnand %p292_p0, %p286_p11 }
  0x21   :  { %296 = shalt.err (!%p293_p1)
}
  0x22   :  { %40 = dma.hbm_to_vmem [thread:$0]  %s418_s3, 512, %s35_s8, [#allocation7], %s326_s28, %s326_s28, %s327_s29  }
  0x23   :  { %319 = dma.done.wait [#allocation4], 256  }
  0x24   :  { %320 = vsyncadd [#allocation4], 4294967040 }
  0x25   :  { %321 = dma.done.wait [#allocation7], 512  }
  0x26   :  { %322 = vsyncadd [#allocation7], 4294966784  ;;  %vm53_vm0 = vcmask 254976   ;;  %v329_v0 = vmov 0.0   ;;  %vm58_vm1 = vcmask 261120   ;;  %v56_v1 = vld [vmem:[#allocation3] sm:$0xff] }
  0x27   :  { %54 = vst.msk [vmem:[#allocation2] sm:$0x3] %vm53_vm0, %v329_v0  ;;  %v57_v2 = vld [vmem:[#allocation3 + $0x8] sm:$0xff]  ;;  %v59_v3 = vsel %vm58_vm1, %v56_v1, 0.0  ;;  %vm75_vm2 = vcmask 1041409   ;;  %v116_v28 = vld [vmem:[#allocation6] sm:$0xff] }
  0x28   :  { %v66_v4 = vsel %vm58_vm1, %v57_v2, 0.0  ;;  %v60_v5 = vrot.slane %v59_v3, 4  ;;  %v117_v29 = vld [vmem:[#allocation6 + $0x8] sm:$0xff]  ;;  %v118_v30 = vld [vmem:[#allocation6 + $0x10] sm:$0xff]  ;;  %v330_v31 = vmov 0.0|0.0   ;;  %v119_v33 = vld [vmem:[#allocation6 + $0x18] sm:$0xff] }
  0x29   :  { %v67_v6 = vrot.slane %v66_v4, 4  ;;  %237 = vmatprep.subr.bf16.mxu0 %v330_v31  ;;  %v238_v32 = vpack.c.bf16 %v117_v29, %v116_v28  ;;  %vm331_vm3 = vmmov 0   ;;  %v241_v34 = vpack.c.bf16 %v119_v33, %v118_v30  ;;  %v217_v39 = vld [vmem:[%s416_s1] ss:$0 sm:$0xff]  ;;  %s332_s23 = smov [#allocation8]  }
  0x2a   :  { %v61_v7 = vadd.f32 %v60_v5, %v59_v3  ;;  %234 = vmatprep.mubr.msk.f32.mxu0 %vm331_vm3, %v329_v0  ;;  %v218_v41 = vld [vmem:[%s417_s2] ss:$0 sm:$0xff]  ;;  %s207_s24 = sshll.u32 %s332_s23, 4  ;;  %s208_s24 = int_to_ptr.vmem [resolvable:$true] %s207_s24 }
  0x2b   :  { %v68_v8 = vadd.f32 %v67_v6, %v66_v4  ;;  %239 = vmatpush3.bf16.msra.mxu0 %v238_v32  ;;  %v219_v44 = vld [vmem:[%s419_s4] ss:$0 sm:$0xff]  ;;  %s297_s1 = scalar_lea.vmem %s208_s24, 32  ;;  %p302_p3 = scmp.lt.s32.totalorder %s208_s24, %s208_s24 }
  0x2c   :  { %v62_v9 = vrot.slane %v61_v7, 2  ;;  %240 = vmatprep.subr.bf16.mxu0 %v330_v31  ;;  %p298_p2 = scmp.ne.s32.totalorder %s208_s24, %s297_s1  ;;  %p303_p4 = scmp.lt.s32.totalorder %s297_s1, %s297_s1 }
  0x2d   :  { %v69_v10 = vrot.slane %v68_v8, 2 }
  0x2e   :  { %v63_v11 = vadd.f32 %v62_v9, %v61_v7  ;;  %v55_v15 = vld [vmem:[#allocation2] sm:$0x3]  ;;  %p304_p5 = por %p303_p4, %p302_p3 }
  0x2f   :  { %v70_v12 = vadd.f32 %v69_v10, %v68_v8  ;;  %242 = vmatpush3.bf16.msra.mxu0 %v241_v34 }
  0x30   :  { %v64_v13 = vrot.slane %v63_v11, 1  ;;  %p305_p6 = pnand %p304_p5, %p298_p2 }
  0x31   :  { %v71_v14 = vrot.slane %v70_v12, 1 }
  0x32   :  { %v65_v16 = vadd.f32 %v64_v13, %v63_v11 }
  0x33   :  { %v72_v17 = vadd.f32 %v71_v14, %v70_v12 }
  0x35   :  { %v76_v18 = vsel %vm75_vm2, %v72_v17, %v65_v16 }
  0x36   :  { %v78_v19 = vadd.f32 %v76_v18, %v55_v15 }
  0x38   :  { %80 = vst.msk [vmem:[#allocation2] sm:$0x3] %vm53_vm0, %v78_v19 }
  0x3f   :  { %v84_v20 = vld [vmem:[#allocation2] sm:$0x3] }
  0x40   :  { %v85_v21 = vmul.f32 0.125, %v84_v20 }
  0x42   :  { %v86_v22 = vsel %vm53_vm0, %v85_v21, 0.0 }
  0x43   :  { %87 = vadd.xlane.f32.xlu0 %v86_v22 }
  0xd0   :  { %v88_v23 = vpop.xlane.xlu0 %87 }
  0xd1   :  { %v90_v24 = vmul.f32 0.03125, %v88_v23 }
  0xd3   :  { %v91_v25 = vsub.f32 %v85_v21, %v90_v24 }
  0xd5   :  { %v92_v26 = vmul.f32 %v91_v25, %v91_v25 }
  0xd7   :  { %v93_v27 = vsel %vm53_vm0, %v92_v26, 0.0 }
  0xd8   :  { %94 = vadd.xlane.f32.xlu0 %v93_v27 }
 0x165   :  { %v95_v35 = vpop.xlane.xlu0 %94 }
 0x166   :  { %v96_v36 = vmul.f32 0.03125, %v95_v35 }
 0x168   :  { %v97_v37 = vadd.f32 1e-05, %v96_v36 }
 0x16a   :  { %251 = vrsqrt.f32 %v97_v37 }
 0x174   :  { %v252_v38 = vpop.eup %251 }
 0x175   :  { %v99_v40 = vmul.f32 %v252_v38, %v91_v25 }
 0x177   :  { %v107_v42 = vmul.f32 %v217_v39, %v99_v40 }
 0x179   :  { %v115_v43 = vadd.f32 %v218_v41, %v107_v42 }
 0x17b   :  { %235 = vmatmul.mubr.msk.f32.vlgmr.msra.gmra.mrb[0].mxu0 %vm58_vm1, %v115_v43 }
 0x24e   :  { %v196_v45 = vpop.f32.mrb[0].mxu0 }
 0x24f   :  { %v197_v46 = vadd.f32 %v219_v44, %v196_v45  ;;  %v236_v47 = vpop.f32.mrb[1].mxu0 }
 0x251   :  { %200 = vst [vmem:[#allocation8] sm:$0x3] %v197_v46 }
 0x252   :  { %308 = shalt.err (!%p305_p6)
}
 0x253   :  { %s309_s26 = scalar_lea.hbm %s420_s5, 32 }
 0x254   :  { %p310_p7 = scmp.ne.s32.totalorder %s420_s5, %s309_s26  ;;  %p313_p8 = scmp.lt.u32.totalorder %s309_s26, %s420_s5 }
 0x256   :  { %p315_p9 = pnand %p313_p8, %p310_p7 }
 0x258   :  { %318 = shalt.err (!%p315_p9)
}
 0x259   :  { %210 = dma.vmem_to_hbm [thread:$0]  %s208_s24, 32, %s420_s5, [#allocation5]  }
 0x25a   :  { %323 = dma.done.wait [#allocation5], 32  }
 0x25b   :  { %324 = vsyncadd [#allocation5], 4294967264 }
 0x25c   :  { %214 = vsyncpa [#allocation4], 1 }
 0x25d   :  { %215 = vsyncpa [#allocation7], 1 }
 0x25e   :  { %216 = vsyncpa [#allocation5], 1 }

// kernel: tpu_custom_call.1
= control target key start
LH: loop header
LB: loop body
LE: loop exit
PB: predicated region body
PF: predicated region fallthrough
CT: control target
= control target key end

     0   :  { %10 = vsyncpa [#allocation4], 0  ;;  %s415_s0 = inlined_call_operand.hbm [shape: f32[2,8,32], index: 0, kind: input, shape index: {}]   ;;  %s416_s1 = inlined_call_operand.vmem [shape: f32[1,32], index: 1, kind: input, shape index: {}]   ;;  %s417_s2 = inlined_call_operand.vmem [shape: f32[1,32], index: 2, kind: input, shape index: {}]   ;;  %s418_s3 = inlined_call_operand.hbm [shape: f32[32,128], index: 3, kind: input, shape index: {}]   ;;  %s419_s4 = inlined_call_operand.vmem [shape: f32[1,128], index: 4, kind: input, shape index: {}]   ;;  %s420_s5 = inlined_call_operand.hbm [shape: f32[2,128], index: 5, kind: output, shape index: {}]  }
   0x1   :  { %11 = vsyncpa [#allocation7], 0 }
   0x2   :  { %12 = vsyncpa [#allocation5], 0  ;;  %s325_s18 = smov [#allocation3]   ;;  %s253_s22 = scalar_lea.hbm %s415_s0, 256 }
   0x3   :  { %s18_s19 = sshll.u32 %s325_s18, 4  ;;  %p254_p0 = scmp.ne.s32.totalorder %s415_s0, %s253_s22  ;;  %s19_s19 = int_to_ptr.vmem [resolvable:$true] %s18_s19 }
   0x4   :  { %p257_p1 = scmp.lt.u32.totalorder %s253_s22, %s415_s0 }
   0x6   :  { %p259_p2 = pnand %p257_p1, %p254_p0 }
   0x8   :  { %262 = shalt.err (!%p259_p2)
}
   0x9   :  { %s263_s27 = scalar_lea.vmem %s19_s19, 256  ;;  %p268_p4 = scmp.lt.s32.totalorder %s19_s19, %s19_s19 }
   0xa   :  { %p264_p3 = scmp.ne.s32.totalorder %s19_s19, %s263_s27  ;;  %p269_p5 = scmp.lt.s32.totalorder %s263_s27, %s263_s27 }
   0xc   :  { %p270_p6 = por %p269_p5, %p268_p4 }
   0xe   :  { %p271_p7 = pnand %p270_p6, %p264_p3 }
  0x10   :  { %274 = shalt.err (!%p271_p7)
}
  0x11   :  { %s326_s28 = smov 128   ;;  %s327_s29 = smov 8  }
  0x12   :  { %24 = dma.hbm_to_vmem [thread:$0]  %s415_s0, 256, %s19_s19, [#allocation4], %s326_s28, %s326_s28, %s327_s29  }
  0x13   :  { %s328_s7 = smov [#allocation6]   ;;  %s275_s11 = scalar_lea.hbm %s418_s3, 512 }
  0x14   :  { %s34_s8 = sshll.u32 %s328_s7, 4  ;;  %p276_p8 = scmp.ne.s32.totalorder %s418_s3, %s275_s11  ;;  %s35_s8 = int_to_ptr.vmem [resolvable:$true] %s34_s8 }
  0x15   :  { %p279_p9 = scmp.lt.u32.totalorder %s275_s11, %s418_s3 }
  0x17   :  { %p281_p10 = pnand %p279_p9, %p276_p8 }
  0x19   :  { %284 = shalt.err (!%p281_p10)
}
  0x1a   :  { %s285_s16 = scalar_lea.vmem %s35_s8, 512  ;;  %p290_p12 = scmp.lt.s32.totalorder %s35_s8, %s35_s8 }
  0x1b   :  { %p286_p11 = scmp.ne.s32.totalorder %s35_s8, %s285_s16  ;;  %p291_p13 = scmp.lt.s32.totalorder %s285_s16, %s285_s16 }
  0x1d   :  { %p292_p0 = por %p291_p13, %p290_p12 }
  0x1f   :  { %p293_p1 = pnand %p292_p0, %p286_p11 }
  0x21   :  { %296 = shalt.err (!%p293_p1)
}
  0x22   :  { %40 = dma.hbm_to_vmem [thread:$0]  %s418_s3, 512, %s35_s8, [#allocation7], %s326_s28, %s326_s28, %s327_s29  }
  0x23   :  { %319 = dma.done.wait [#allocation4], 256  }
  0x24   :  { %320 = vsyncadd [#allocation4], 4294967040 }
  0x25   :  { %321 = dma.done.wait [#allocation7], 512  }
  0x26   :  { %322 = vsyncadd [#allocation7], 4294966784  ;;  %vm53_vm0 = vcmask 254976   ;;  %v329_v0 = vmov 0.0   ;;  %vm58_vm1 = vcmask 261120   ;;  %v56_v1 = vld [vmem:[#allocation3] sm:$0xff] }
  0x27   :  { %54 = vst.msk [vmem:[#allocation2] sm:$0x3] %vm53_vm0, %v329_v0  ;;  %v57_v2 = vld [vmem:[#allocation3 + $0x8] sm:$0xff]  ;;  %v59_v3 = vsel %vm58_vm1, %v56_v1, 0.0  ;;  %vm75_vm2 = vcmask 1041409   ;;  %v116_v28 = vld [vmem:[#allocation6] sm:$0xff] }
  0x28   :  { %v66_v4 = vsel %vm58_vm1, %v57_v2, 0.0  ;;  %v60_v5 = vrot.slane %v59_v3, 4  ;;  %v117_v29 = vld [vmem:[#allocation6 + $0x8] sm:$0xff]  ;;  %v118_v30 = vld [vmem:[#allocation6 + $0x10] sm:$0xff]  ;;  %v330_v31 = vmov 0.0|0.0   ;;  %v119_v33 = vld [vmem:[#allocation6 + $0x18] sm:$0xff] }
  0x29   :  { %v67_v6 = vrot.slane %v66_v4, 4  ;;  %237 = vmatprep.subr.bf16.mxu0 %v330_v31  ;;  %v238_v32 = vpack.c.bf16 %v117_v29, %v116_v28  ;;  %vm331_vm3 = vmmov 0   ;;  %v241_v34 = vpack.c.bf16 %v119_v33, %v118_v30  ;;  %v217_v39 = vld [vmem:[%s416_s1] ss:$0 sm:$0xff]  ;;  %s332_s23 = smov [#allocation8]  }
  0x2a   :  { %v61_v7 = vadd.f32 %v60_v5, %v59_v3  ;;  %234 = vmatprep.mubr.msk.f32.mxu0 %vm331_vm3, %v329_v0  ;;  %v218_v41 = vld [vmem:[%s417_s2] ss:$0 sm:$0xff]  ;;  %s207_s24 = sshll.u32 %s332_s23, 4  ;;  %s208_s24 = int_to_ptr.vmem [resolvable:$true] %s207_s24 }
  0x2b   :  { %v68_v8 = vadd.f32 %v67_v6, %v66_v4  ;;  %239 = vmatpush3.bf16.msra.mxu0 %v238_v32  ;;  %v219_v44 = vld [vmem:[%s419_s4] ss:$0 sm:$0xff]  ;;  %s297_s1 = scalar_lea.vmem %s208_s24, 32  ;;  %p302_p3 = scmp.lt.s32.totalorder %s208_s24, %s208_s24 }
  0x2c   :  { %v62_v9 = vrot.slane %v61_v7, 2  ;;  %240 = vmatprep.subr.bf16.mxu0 %v330_v31  ;;  %p298_p2 = scmp.ne.s32.totalorder %s208_s24, %s297_s1  ;;  %p303_p4 = scmp.lt.s32.totalorder %s297_s1, %s297_s1 }
  0x2d   :  { %v69_v10 = vrot.slane %v68_v8, 2 }
  0x2e   :  { %v63_v11 = vadd.f32 %v62_v9, %v61_v7  ;;  %v55_v15 = vld [vmem:[#allocation2] sm:$0x3]  ;;  %p304_p5 = por %p303_p4, %p302_p3 }
  0x2f   :  { %v70_v12 = vadd.f32 %v69_v10, %v68_v8  ;;  %242 = vmatpush3.bf16.msra.mxu0 %v241_v34 }
  0x30   :  { %v64_v13 = vrot.slane %v63_v11, 1  ;;  %p305_p6 = pnand %p304_p5, %p298_p2 }
  0x31   :  { %v71_v14 = vrot.slane %v70_v12, 1 }
  0x32   :  { %v65_v16 = vadd.f32 %v64_v13, %v63_v11 }
  0x33   :  { %v72_v17 = vadd.f32 %v71_v14, %v70_v12 }
  0x35   :  { %v76_v18 = vsel %vm75_vm2, %v72_v17, %v65_v16 }
  0x36   :  { %v78_v19 = vadd.f32 %v76_v18, %v55_v15 }
  0x38   :  { %80 = vst.msk [vmem:[#allocation2] sm:$0x3] %vm53_vm0, %v78_v19 }
  0x3f   :  { %v84_v20 = vld [vmem:[#allocation2] sm:$0x3] }
  0x40   :  { %v85_v21 = vmul.f32 0.125, %v84_v20 }
  0x42   :  { %v86_v22 = vsel %vm53_vm0, %v85_v21, 0.0 }
  0x43   :  { %87 = vadd.xlane.f32.xlu0 %v86_v22 }
  0xd0   :  { %v88_v23 = vpop.xlane.xlu0 %87 }
  0xd1   :  { %v90_v24 = vmul.f32 0.03125, %v88_v23 }
  0xd3   :  { %v91_v25 = vsub.f32 %v85_v21, %v90_v24 }
  0xd5   :  { %v92_v26 = vmul.f32 %v91_v25, %v91_v25 }
  0xd7   :  { %v93_v27 = vsel %vm53_vm0, %v92_v26, 0.0 }
  0xd8   :  { %94 = vadd.xlane.f32.xlu0 %v93_v27 }
 0x165   :  { %v95_v35 = vpop.xlane.xlu0 %94 }
 0x166   :  { %v96_v36 = vmul.f32 0.03125, %v95_v35 }
 0x168   :  { %v97_v37 = vadd.f32 1e-05, %v96_v36 }
 0x16a   :  { %251 = vrsqrt.f32 %v97_v37 }
 0x174   :  { %v252_v38 = vpop.eup %251 }
 0x175   :  { %v99_v40 = vmul.f32 %v252_v38, %v91_v25 }
 0x177   :  { %v107_v42 = vmul.f32 %v217_v39, %v99_v40 }
 0x179   :  { %v115_v43 = vadd.f32 %v218_v41, %v107_v42 }
 0x17b   :  { %235 = vmatmul.mubr.msk.f32.vlgmr.msra.gmra.mrb[0].mxu0 %vm58_vm1, %v115_v43 }
 0x24e   :  { %v196_v45 = vpop.f32.mrb[0].mxu0 }
 0x24f   :  { %v197_v46 = vadd.f32 %v219_v44, %v196_v45  ;;  %v236_v47 = vpop.f32.mrb[1].mxu0 }
 0x251   :  { %200 = vst [vmem:[#allocation8] sm:$0x3] %v197_v46 }
 0x252   :  { %308 = shalt.err (!%p305_p6)
}
 0x253   :  { %s309_s26 = scalar_lea.hbm %s420_s5, 32 }
 0x254   :  { %p310_p7 = scmp.ne.s32.totalorder %s420_s5, %s309_s26  ;;  %p313_p8 = scmp.lt.u32.totalorder %s309_s26, %s420_s5 }
 0x256   :  { %p315_p9 = pnand %p313_p8, %p310_p7 }
 0x258   :  { %318 = shalt.err (!%p315_p9)
}
 0x259   :  { %210 = dma.vmem_to_hbm [thread:$0]  %s208_s24, 32, %s420_s5, [#allocation5]  }
 0x25a   :  { %323 = dma.done.wait [#allocation5], 32  }
 0x25b   :  { %324 = vsyncadd [#allocation5], 4294967264 }
 0x25c   :  { %214 = vsyncpa [#allocation4], 1 }
 0x25d   :  { %215 = vsyncpa [#allocation7], 1 }
 0x25e   :  { %216 = vsyncpa [#allocation5], 1 }

</bundles_post_ra>
